<compile_context>
chip_gen: v7x
topology: tpu7x:2x2x1
jax: 0.10.0
libtpu: 0.0.40
codegen_flags: <defaults>
</compile_context>

<pallas_src>
import jax
import jax.numpy as jnp
from jax import lax
from jax.experimental import pallas as pl
from jax.experimental.pallas import tpu as pltpu


def _round_up(x, m):
    return ((x + m - 1) // m) * m


def _act(h, act):
    if act == "relu":
        return jnp.maximum(h, 0.0)
    if act == "tanh":
        return jnp.tanh(h)
    return h


def _vmem_limit_bytes():
    """<=48 MiB on 64-MiB-VMEM chips (v7x); 64 MiB on 128-MiB chips (v5e/v6e)."""
    cap = 128 * 1024 * 1024
    try:
        cap = int(getattr(pltpu.get_tpu_info(), "vmem_capacity_bytes", cap))
    except Exception:
        pass
    return int(min(64 * 1024 * 1024, cap * 3 // 4))


def _pad_wc(w, c, co_pad, ci_pad):
    """Zero-pad a (Cout, Cin) weight / (Cout, 1) bias pair (exact no-op)."""
    co, ci = w.shape
    if (co_pad, ci_pad) == (co, ci):
        return w, c
    wp = jnp.zeros((co_pad, ci_pad), w.dtype).at[:co, :ci].set(w)
    cp = jnp.zeros((co_pad, 1), c.dtype).at[:co, :].set(c)
    return wp, cp


# ---------------------------------------------------------------------------
# Kernel 1: encoder conv stack fused with the global max-pool over points.
# ---------------------------------------------------------------------------

def encoder_maxpool(x_ncl, layers, *, tn=1024, param_dtype=jnp.bfloat16):
    """x_ncl: (B, 3, N).  layers: [(w, c, act)], BN folded.  Returns (B, nlatent) f32."""
    B, C0, N = x_ncl.shape
    layers = list(layers)

    c0_pad = _round_up(C0, 8)
    if c0_pad != C0:
        x_ncl = jnp.pad(x_ncl, ((0, 0), (0, c0_pad - C0), (0, 0)))
        w0, b0, a0 = layers[0]
        layers[0] = (jnp.pad(w0, ((0, 0), (0, c0_pad - C0))), b0, a0)

    tn = max(128, min(_round_up(tn, 128), _round_up(N, 128)))
    n_pad = _round_up(N, tn)
    if n_pad != N:
        x_ncl = jnp.pad(x_ncl, ((0, 0), (0, 0), (0, n_pad - N)))
    n_tiles = n_pad // tn

    acts = tuple(a for (_, _, a) in layers)
    c_last = layers[-1][0].shape[0]

    def kernel(x_ref, *refs):
        o_ref = refs[-1]
        h = x_ref[0].astype(jnp.float32)                          # (C0, tn)
        for li, act in enumerate(acts):
            w = refs[2 * li][...]
            c = refs[2 * li + 1][...].astype(jnp.float32)
            h = jnp.dot(w, h.astype(w.dtype),
                        preferred_element_type=jnp.float32) + c
            h = _act(h, act)
        n_idx = pl.program_id(1)
        # Mask padded point columns so they can never win the running max
        # (last layer has no activation -> padding would surface the bias).
        col = lax.broadcasted_iota(jnp.int32, h.shape, 1) + n_idx * tn
        h = jnp.where(col < N, h, -jnp.inf)
        tmax = jnp.max(h, axis=1, keepdims=True)                  # (c_last, 1)

        @pl.when(n_idx == 0)
        def _():
            o_ref[0] = tmax

        @pl.when(n_idx > 0)
        def _():
            o_ref[0] = jnp.maximum(o_ref[0], tmax)

    in_specs = [pl.BlockSpec((1, c0_pad, tn), lambda b, n: (b, 0, n))]
    flat = [x_ncl]
    for (w, c, _) in layers:
        co, ci = w.shape
        # Constant index_map: weights resident, never re-DMA'd per point tile.
        in_specs.append(pl.BlockSpec((co, ci), lambda b, n: (0, 0)))
        in_specs.append(pl.BlockSpec((co, 1), lambda b, n: (0, 0)))
        flat.append(w.astype(param_dtype))
        flat.append(c.astype(jnp.float32))

    out = pl.pallas_call(
        kernel,
        out_shape=jax.ShapeDtypeStruct((B, c_last, 1), jnp.float32),
        grid_spec=pltpu.PrefetchScalarGridSpec(
            num_scalar_prefetch=0,
            grid=(B, n_tiles),
            in_specs=in_specs,
            # Constant block index along the point axis -> resident running-max
            # accumulator; only (B, nlatent) ever touches HBM.
            out_specs=pl.BlockSpec((1, c_last, 1), lambda b, n: (b, 0, 0)),
        ),
        compiler_params=pltpu.CompilerParams(
            dimension_semantics=("parallel", "arbitrary"),
            vmem_limit_bytes=_vmem_limit_bytes(),
        ),
    )(*flat)
    return out[:, :, 0]


# ---------------------------------------------------------------------------
# Kernel 2: all patch deform MLPs + decoders in one call (stacked weights).
# ---------------------------------------------------------------------------

def _make_patch_kernel(def_acts, dec_acts):
    def kernel(g_ref, *refs):
        d_ref, o_ref = refs[-2], refs[-1]
        wr = refs[:-2]
        h = g_ref[0, 0].astype(jnp.float32)                       # (Dp_pad, tn)
        i = 0
        for act in def_acts:
            w = wr[i][0]
            c = wr[i + 1][0].astype(jnp.float32)
            i += 2
            h = jnp.dot(w, h.astype(w.dtype),
                        preferred_element_type=jnp.float32) + c
            h = _act(h, act)
        d_ref[0, 0] = h.astype(d_ref.dtype)                       # deformed patch
        for li, act in enumerate(dec_acts):
            w = wr[i][0]
            if li == 0:
                # Per-(patch, batch) bias: the latent contribution of the first
                # decoder layer folded outside the kernel (K drops 1027 -> 3).
                c = wr[i + 1][0, 0].astype(jnp.float32)
            else:
                c = wr[i + 1][0].astype(jnp.float32)
            i += 2
            h = jnp.dot(w, h.astype(w.dtype),
                        preferred_element_type=jnp.float32) + c
            h = _act(h, act)
        o_ref[0, 0] = h.astype(o_ref.dtype)

    return kernel


def fused_patch_forward(grids, lat, deform_list, decoder_list, *,
                        tn=512, param_dtype=jnp.bfloat16):
    """All patches in one pallas_call.

    grids: (npatch, B, patch_dim, n_per) uniform grids.
    lat:   (B, nlatent) encoder latent.
    deform_list / decoder_list: per-patch [(w, c, act)] lists, BN folded.
    Returns (d (npatch, B, Dd, n_per) f32, out (npatch, B, 3, n_per) f32).
    """
    npatch, B, Dp, n_per = grids.shape
    Dd = deform_list[0][-1][0].shape[0]
    c_out = decoder_list[0][-1][0].shape[0]
    mult = 16 if jnp.dtype(param_dtype) == jnp.dtype(jnp.bfloat16) else 8

    # torch: rand_grid[:, 2:, :] = 0
    if Dp > 2:
        grids = grids.at[:, :, 2:, :].set(0.0)

    # Channel / point zero-padding (zeros x zero weight rows/cols == exact no-op).
    dp_pad = _round_up(Dp, 8)
    if dp_pad != Dp:
        grids = jnp.pad(grids, ((0, 0), (0, 0), (0, dp_pad - Dp), (0, 0)))
    tn = max(128, min(_round_up(tn, 128), _round_up(n_per, 128)))
    n_pad = _round_up(n_per, tn)
    if n_pad != n_per:
        grids = jnp.pad(grids, ((0, 0), (0, 0), (0, 0), (0, n_pad - n_per)))
    n_tiles = n_pad // tn

    # --- stacked deform MLP weights: (npatch, Cout, Cin) per layer ----------
    L_def = len(deform_list[0])
    def_stack, def_acts = [], []
    prev_pad = dp_pad
    for li in range(L_def):
        co, _ = deform_list[0][li][0].shape
        act = deform_list[0][li][2]
        ci_pad = prev_pad
        co_pad = co if li == L_def - 1 else _round_up(co, mult)
        pads = [_pad_wc(p[li][0], p[li][1], co_pad, ci_pad) for p in deform_list]
        def_stack.append((jnp.stack([w for w, _ in pads]),
                          jnp.stack([c for _, c in pads])))
        def_acts.append(act)
        prev_pad = co_pad

    # --- decoder: fold the broadcast latent into a per-batch bias -----------
    L_dec = len(decoder_list[0])
    w1 = [p[0][0] for p in decoder_list]                  # (C1, Dd + nlatent)
    c1 = [p[0][1] for p in decoder_list]                  # (C1, 1)
    dec0_act = decoder_list[0][0][2]
    C1 = w1[0].shape[0]
    C1_pad = C1 if L_dec == 1 else _round_up(C1, mult)
    w1d = jnp.stack([jnp.zeros((C1_pad, Dd), w.dtype).at[:C1].set(w[:, :Dd])
                     for w in w1])                        # (P, C1_pad, Dd)
    w1lat = jnp.stack([w[:, Dd:] for w in w1])            # (P, C1, nlatent)
    bias1 = jnp.einsum("pon,bn->pbo", w1lat, lat) + jnp.stack(c1)[:, None, :, 0]
    bias1 = jnp.pad(bias1, ((0, 0), (0, 0), (0, C1_pad - C1)))[..., None]

    dec_stack, dec_acts = [], [dec0_act]
    prev_pad = C1_pad
    for li in range(1, L_dec):
        co, _ = decoder_list[0][li][0].shape
        act = decoder_list[0][li][2]
        ci_pad = prev_pad
        co_pad = co if li == L_dec - 1 else _round_up(co, mult)
        pads = [_pad_wc(p[li][0], p[li][1], co_pad, ci_pad) for p in decoder_list]
        dec_stack.append((jnp.stack([w for w, _ in pads]),
                          jnp.stack([c for _, c in pads])))
        dec_acts.append(act)
        prev_pad = co_pad

    # --- pallas_call plumbing ------------------------------------------------
    flat = [grids]
    in_specs = [pl.BlockSpec((1, 1, dp_pad, tn), lambda p, b, n: (p, b, 0, n))]
    for (w, c) in def_stack:
        _, co, ci = w.shape
        in_specs.append(pl.BlockSpec((1, co, ci), lambda p, b, n: (p, 0, 0)))
        in_specs.append(pl.BlockSpec((1, co, 1), lambda p, b, n: (p, 0, 0)))
        flat += [w.astype(param_dtype), c.astype(jnp.float32)]
    in_specs.append(pl.BlockSpec((1, C1_pad, Dd), lambda p, b, n: (p, 0, 0)))
    in_specs.append(pl.BlockSpec((1, 1, C1_pad, 1), lambda p, b, n: (p, b, 0, 0)))
    flat += [w1d.astype(param_dtype), bias1.astype(jnp.float32)]
    for (w, c) in dec_stack:
        _, co, ci = w.shape
        in_specs.append(pl.BlockSpec((1, co, ci), lambda p, b, n: (p, 0, 0)))
        in_specs.append(pl.BlockSpec((1, co, 1), lambda p, b, n: (p, 0, 0)))
        flat += [w.astype(param_dtype), c.astype(jnp.float32)]

    d_out, out = pl.pallas_call(
        _make_patch_kernel(tuple(def_acts), tuple(dec_acts)),
        out_shape=(jax.ShapeDtypeStruct((npatch, B, Dd, n_pad), jnp.float32),
                   jax.ShapeDtypeStruct((npatch, B, c_out, n_pad), jnp.float32)),
        grid_spec=pltpu.PrefetchScalarGridSpec(
            num_scalar_prefetch=0,
            grid=(npatch, B, n_tiles),
            in_specs=in_specs,
            out_specs=[pl.BlockSpec((1, 1, Dd, tn), lambda p, b, n: (p, b, 0, n)),
                       pl.BlockSpec((1, 1, c_out, tn), lambda p, b, n: (p, b, 0, n))],
        ),
        compiler_params=pltpu.CompilerParams(
            # All axes independent -> on v7x both TensorCores always have work,
            # even at B == 1, thanks to the stacked patch axis.
            dimension_semantics=("parallel", "parallel", "parallel"),
            vmem_limit_bytes=_vmem_limit_bytes(),
        ),
    )(*flat)

    if n_pad != n_per:
        d_out = d_out[..., :n_per]
        out = out[..., :n_per]
    return d_out, out


# ---------------------------------------------------------------------------
# Parameters (deterministic init mirroring the PyTorch submodule shapes).
# ---------------------------------------------------------------------------

def _key_stream(key):
    i = 0
    while True:
        i += 1
        yield jax.random.fold_in(key, i)


def _rand(k, shape, scale=0.1):
    return scale * jax.random.normal(k, shape, jnp.float32)


def make_params(key, *, nlatent, patch_dim, patch_deform_dim, npatch, eps=1e-5):
    """Conv1d(k=1) weights stored as (Cout, Cin); inference-mode BatchNorm1d is
    folded into the preceding conv:  act(scale*(Wx + b - mean) + beta)
                                   = act((scale*W) x + shift)."""
    ks = _key_stream(key)

    def conv(cin, cout, act):
        w = _rand(next(ks), (cout, cin))
        b = _rand(next(ks), (cout,))
        return (w, b[:, None], act)

    def conv_bn(cin, cout, act):
        w = _rand(next(ks), (cout, cin))
        b = _rand(next(ks), (cout,))
        gamma = 1.0 + _rand(next(ks), (cout,))
        beta = _rand(next(ks), (cout,))
        mean = _rand(next(ks), (cout,))
        var = jnp.abs(1.0 + _rand(next(ks), (cout,)))
        scale = gamma / jnp.sqrt(var + eps)
        return (w * scale[:, None], (scale * (b - mean) + beta)[:, None], act)

    # PointNetfeat conv stack: relu(bn1(conv1)), relu(bn2(conv2)), bn3(conv3).
    enc_convs = [conv_bn(3, 64, "relu"),
                 conv_bn(64, 128, "relu"),
                 conv_bn(128, nlatent, "none")]

    # PointNetfeat head: relu(bn4(lin(x)))  (same folding).
    w = _rand(next(ks), (nlatent, nlatent))
    b = _rand(next(ks), (nlatent,))
    gamma = 1.0 + _rand(next(ks), (nlatent,))
    beta = _rand(next(ks), (nlatent,))
    mean = _rand(next(ks), (nlatent,))
    var = jnp.abs(1.0 + _rand(next(ks), (nlatent,)))
    scale = gamma / jnp.sqrt(var + eps)
    enc_lin_w = w * scale[:, None]
    enc_lin_c = scale * (b - mean) + beta

    nl_dec = patch_deform_dim + nlatent
    deform, decoder = [], []
    for _ in range(npatch):
        deform.append([conv_bn(patch_dim, 128, "relu"),
                       conv_bn(128, 128, "relu"),
                       conv(128, patch_deform_dim, "tanh")])
        decoder.append([conv_bn(nl_dec, nl_dec, "relu"),
                        conv_bn(nl_dec, nl_dec // 2, "relu"),
                        conv_bn(nl_dec // 2, nl_dec // 4, "relu"),
                        conv(nl_dec // 4, 3, "tanh")])

    return {"enc_convs": enc_convs, "enc_lin_w": enc_lin_w,
            "enc_lin_c": enc_lin_c, "deform": deform, "decoder": decoder}


# ---------------------------------------------------------------------------
# Full PatchDeformMLPAdj forward.
# ---------------------------------------------------------------------------

def patch_deform_mlp_adj_forward(x_points, rand_grids, params, *,
                                 tn_enc=1024, tn_dec=512,
                                 param_dtype=jnp.bfloat16):
    """x_points: (B, npoint, 3).  rand_grids: list (len npatch) of
    (B, patch_dim, npoint // npatch) uniform(0,1) grids (the torch module draws
    these with CUDA RNG per call; here the caller supplies them via jax.random).
    Returns (out (B, npatch*(npoint//npatch), 3), patches [(n_per, patchDeformDim)])."""
    B = x_points.shape[0]

    # Encoder: conv stack + global max-pool fused in one Pallas kernel.
    x_ncl = jnp.transpose(x_points, (0, 2, 1))                    # (B, 3, npoint)
    g = encoder_maxpool(x_ncl, params["enc_convs"], tn=tn_enc,
                        param_dtype=param_dtype)
    # TODO(synk): the tiny (B, nlatent) Linear+BN4+ReLU head and the per-batch
    # latent-bias projection inside fused_patch_forward stay in plain JAX
    # (negligible vs the per-point conv work).
    lat = jnp.maximum(g @ params["enc_lin_w"].T + params["enc_lin_c"], 0.0)

    grids = jnp.stack(rand_grids, axis=0)                         # (P, B, Dp, n_per)
    d, out = fused_patch_forward(grids, lat, params["deform"], params["decoder"],
                                 tn=tn_dec, param_dtype=param_dtype)
    npatch, _, _, n_per = d.shape
    patches = [jnp.transpose(d[i, 0], (1, 0)) for i in range(npatch)]
    out_pts = jnp.transpose(out, (1, 0, 3, 2)).reshape(B, npatch * n_per, 3)
    return out_pts, patches


# ---------------------------------------------------------------------------
# Pure-JAX f32 reference following the ORIGINAL torch structure
# (full feature map + max, concat(lat) decoder input; BN already folded).
# ---------------------------------------------------------------------------

def _ref_stack(h, layers):
    for (w, c, act) in layers:
        h = jnp.einsum("oc,bcn->bon", w, h) + c[None]
        h = _act(h, act)
    return h


def reference_forward(x_points, rand_grids, params):
    B = x_points.shape[0]
    x_ncl = jnp.transpose(x_points, (0, 2, 1))
    feat = _ref_stack(x_ncl, params["enc_convs"])
    g = jnp.max(feat, axis=2)
    lat = jnp.maximum(g @ params["enc_lin_w"].T + params["enc_lin_c"], 0.0)
    outs, patches = [], []
    for i, grid in enumerate(rand_grids):
        if grid.shape[1] > 2:
            grid = grid.at[:, 2:, :].set(0.0)
        d = _ref_stack(grid, params["deform"][i])
        patches.append(jnp.transpose(d[0], (1, 0)))
        n_per = d.shape[2]
        y = jnp.concatenate(
            [d, jnp.broadcast_to(lat[:, :, None], (B, lat.shape[1], n_per))], axis=1)
        outs.append(_ref_stack(y, params["decoder"][i]))
    out = jnp.transpose(jnp.concatenate(outs, axis=2), (0, 2, 1))
    return out, patches


if __name__ == "__main__":
    # Small stand-ins for the defaults (npoint=2500, nlatent=1024, npatch=10).
    # npoint=300 deliberately NOT a multiple of 128 so the point-padding /
    # max-pool masking paths are exercised.
    B, npoint, npatch = 2, 300, 2
    nlatent, patch_dim, patch_deform_dim = 29, 2, 3     # decoder width 29 + 3 = 32
    n_per = npoint // npatch

    key = jax.random.PRNGKey(0)
    kx, kg, kp = jax.random.split(key, 3)
    x = jax.random.normal(kx, (B, npoint, 3), jnp.float32)
    rand_grids = [jax.random.uniform(jax.random.fold_in(kg, i),
                                     (B, patch_dim, n_per), jnp.float32)
                  for i in range(npatch)]
    params = make_params(kp, nlatent=nlatent, patch_dim=patch_dim,
                         patch_deform_dim=patch_deform_dim, npatch=npatch)

    ref_out, ref_patches = reference_forward(x, rand_grids, params)

    # f32 path with small point tiles: exercises multi-tile max accumulation,
    # point padding/masking, and the latent-bias fold (which is exact).
    out32, patches32 = patch_deform_mlp_adj_forward(
        x, rand_grids, params, tn_enc=128, tn_dec=128, param_dtype=jnp.float32)
    out32 = jax.block_until_ready(out32)
    assert out32.shape == (B, npoint, 3), out32.shape
    assert len(patches32) == npatch and patches32[0].shape == (n_per, patch_deform_dim)
    err = float(jnp.max(jnp.abs(out32 - ref_out)))
    assert err < 5e-3, f"f32 decoder output mismatch: max abs err {err}"
    for p, rp in zip(patches32, ref_patches):
        perr = float(jnp.max(jnp.abs(p - rp)))
        assert perr < 5e-3, f"f32 patch mismatch: max abs err {perr}"

    # Default fast path: bf16 weights / MXU inputs with f32 accumulation.
    out_bf, patches_bf = patch_deform_mlp_adj_forward(x, rand_grids, params)
    out_bf = jax.block_until_ready(out_bf)
    assert out_bf.shape == (B, npoint, 3), out_bf.shape
    err_bf = float(jnp.max(jnp.abs(out_bf - ref_out)))
    assert err_bf < 3e-2, f"bf16 decoder output mismatch: max abs err {err_bf}"
    for p, rp in zip(patches_bf, ref_patches):
        perr = float(jnp.max(jnp.abs(p - rp)))
        assert perr < 3e-2, f"bf16 patch mismatch: max abs err {perr}"

    print("KERNEL_OK")
</pallas_src>

<mosaic_0001>
module attributes {stable_mosaic.version = 11 : i64} {
  func.func @kernel(%arg0: i32, %arg1: i32, %arg2: memref<1x8x128xf32, #tpu.memory_space<vmem>>, %arg3: memref<64x8xf32, #tpu.memory_space<vmem>>, %arg4: memref<64x1xf32, #tpu.memory_space<vmem>>, %arg5: memref<128x64xf32, #tpu.memory_space<vmem>>, %arg6: memref<128x1xf32, #tpu.memory_space<vmem>>, %arg7: memref<29x128xf32, #tpu.memory_space<vmem>>, %arg8: memref<29x1xf32, #tpu.memory_space<vmem>>, %arg9: memref<1x29x1xf32, #tpu.memory_space<vmem>>) attributes {dimension_semantics = [#tpu.dimension_semantics<parallel>, #tpu.dimension_semantics<arbitrary>], iteration_bounds = array<i64: 2, 3>, scalar_prefetch = 0 : i64, scratch_operands = 0 : i64, tpu.core_type = #tpu.core_type<tc>, window_params = [{transform_indices = @transform_0, window_bounds = array<i64: 1, 8, 128>}, {pipeline_mode = #tpu.pipeline_mode<synchronous>, transform_indices = @transform_1, window_bounds = array<i64: 64, 8>}, {pipeline_mode = #tpu.pipeline_mode<synchronous>, transform_indices = @transform_2, window_bounds = array<i64: 64, 1>}, {pipeline_mode = #tpu.pipeline_mode<synchronous>, transform_indices = @transform_3, window_bounds = array<i64: 128, 64>}, {pipeline_mode = #tpu.pipeline_mode<synchronous>, transform_indices = @transform_4, window_bounds = array<i64: 128, 1>}, {pipeline_mode = #tpu.pipeline_mode<synchronous>, transform_indices = @transform_5, window_bounds = array<i64: 29, 128>}, {pipeline_mode = #tpu.pipeline_mode<synchronous>, transform_indices = @transform_6, window_bounds = array<i64: 29, 1>}, {transform_indices = @transform_7, window_bounds = array<i64: 1, 29, 1>}]} {
    %c0 = arith.constant 0 : index
    %c0_0 = arith.constant 0 : index
    %c0_1 = arith.constant 0 : index
    %0 = vector.load %arg2[%c0, %c0_0, %c0_1] : memref<1x8x128xf32, #tpu.memory_space<vmem>>, vector<1x8x128xf32>
    %1 = vector.shape_cast %0 : vector<1x8x128xf32> to vector<8x128xf32>
    %c0_2 = arith.constant 0 : index
    %c0_3 = arith.constant 0 : index
    %2 = vector.load %arg3[%c0_2, %c0_3] : memref<64x8xf32, #tpu.memory_space<vmem>>, vector<64x8xf32>
    %c0_4 = arith.constant 0 : index
    %c0_5 = arith.constant 0 : index
    %3 = vector.load %arg4[%c0_4, %c0_5] : memref<64x1xf32, #tpu.memory_space<vmem>>, vector<64x1xf32>
    %cst = arith.constant dense<0.000000e+00> : vector<64x128xf32>
    %4 = tpu.matmul %2, %1, %cst {dimension_numbers = #tpu.dot_dimension_numbers<[1], [0], [0], [1], [0, 0, 1, 1], [], []>} : vector<64x8xf32>, vector<8x128xf32>, vector<64x128xf32> -> vector<64x128xf32>
    %5 = vector.broadcast %3 : vector<64x1xf32> to vector<64x128xf32>
    %6 = arith.addf %4, %5 : vector<64x128xf32>
    %cst_6 = arith.constant 0.000000e+00 : f32
    %7 = vector.broadcast %cst_6 : f32 to vector<64x128xf32>
    %8 = arith.maximumf %6, %7 : vector<64x128xf32>
    %c0_7 = arith.constant 0 : index
    %c0_8 = arith.constant 0 : index
    %9 = vector.load %arg5[%c0_7, %c0_8] : memref<128x64xf32, #tpu.memory_space<vmem>>, vector<128x64xf32>
    %c0_9 = arith.constant 0 : index
    %c0_10 = arith.constant 0 : index
    %10 = vector.load %arg6[%c0_9, %c0_10] : memref<128x1xf32, #tpu.memory_space<vmem>>, vector<128x1xf32>
    %cst_11 = arith.constant dense<0.000000e+00> : vector<128x128xf32>
    %11 = tpu.matmul %9, %8, %cst_11 {dimension_numbers = #tpu.dot_dimension_numbers<[1], [0], [0], [1], [0, 0, 1, 1], [], []>} : vector<128x64xf32>, vector<64x128xf32>, vector<128x128xf32> -> vector<128x128xf32>
    %12 = vector.broadcast %10 : vector<128x1xf32> to vector<128x128xf32>
    %13 = arith.addf %11, %12 : vector<128x128xf32>
    %cst_12 = arith.constant 0.000000e+00 : f32
    %14 = vector.broadcast %cst_12 : f32 to vector<128x128xf32>
    %15 = arith.maximumf %13, %14 : vector<128x128xf32>
    %c0_13 = arith.constant 0 : index
    %c0_14 = arith.constant 0 : index
    %16 = vector.load %arg7[%c0_13, %c0_14] : memref<29x128xf32, #tpu.memory_space<vmem>>, vector<29x128xf32>
    %c0_15 = arith.constant 0 : index
    %c0_16 = arith.constant 0 : index
    %17 = vector.load %arg8[%c0_15, %c0_16] : memref<29x1xf32, #tpu.memory_space<vmem>>, vector<29x1xf32>
    %cst_17 = arith.constant dense<0.000000e+00> : vector<29x128xf32>
    %18 = tpu.matmul %16, %15, %cst_17 {dimension_numbers = #tpu.dot_dimension_numbers<[1], [0], [0], [1], [0, 0, 1, 1], [], []>} : vector<29x128xf32>, vector<128x128xf32>, vector<29x128xf32> -> vector<29x128xf32>
    %19 = vector.broadcast %17 : vector<29x1xf32> to vector<29x128xf32>
    %20 = arith.addf %18, %19 : vector<29x128xf32>
    %21 = tpu.iota {dimensions = array<i32: 1>} : vector<29x128xi32>
    %c128_i32 = arith.constant 128 : i32
    %22 = arith.muli %arg1, %c128_i32 : i32
    %23 = vector.broadcast %22 : i32 to vector<29x128xi32>
    %24 = arith.addi %21, %23 : vector<29x128xi32>
    %c300_i32 = arith.constant 300 : i32
    %25 = vector.broadcast %c300_i32 : i32 to vector<29x128xi32>
    %26 = arith.cmpi slt, %24, %25 : vector<29x128xi32>
    %cst_18 = arith.constant 0xFF800000 : f32
    %27 = vector.broadcast %cst_18 : f32 to vector<29x128xf32>
    %28 = arith.select %26, %20, %27 : vector<29x128xi1>, vector<29x128xf32>
    %cst_19 = arith.constant dense<0xFF800000> : vector<29xf32>
    %29 = vector.multi_reduction <maximumf>, %28, %cst_19 [1] : vector<29x128xf32> to vector<29xf32>
    %30 = vector.shape_cast %29 : vector<29xf32> to vector<29x1xf32>
    %c0_i32 = arith.constant 0 : i32
    %31 = arith.cmpi eq, %arg1, %c0_i32 : i32
    %32 = arith.extui %31 : i1 to i32
    %c0_i32_20 = arith.constant 0 : i32
    %33 = arith.cmpi ne, %32, %c0_i32_20 : i32
    scf.if %33 {
      %c0_23 = arith.constant 0 : index
      %c0_24 = arith.constant 0 : index
      %c0_25 = arith.constant 0 : index
      %37 = vector.load %arg9[%c0_23, %c0_24, %c0_25] : memref<1x29x1xf32, #tpu.memory_space<vmem>>, vector<1x29x1xf32>
      %38 = vector.shape_cast %37 : vector<1x29x1xf32> to vector<29x1xf32>
      %39 = vector.shape_cast %30 : vector<29x1xf32> to vector<1x29x1xf32>
      tpu.vector_store %arg9[%c0_23, %c0_24, %c0_25], %39 {strides = array<i32>} : memref<1x29x1xf32, #tpu.memory_space<vmem>>, vector<1x29x1xf32>,
    } else {
    }
    %c0_i32_21 = arith.constant 0 : i32
    %34 = arith.cmpi sgt, %arg1, %c0_i32_21 : i32
    %35 = arith.extui %34 : i1 to i32
    %c0_i32_22 = arith.constant 0 : i32
    %36 = arith.cmpi ne, %35, %c0_i32_22 : i32
    scf.if %36 {
      %c0_23 = arith.constant 0 : index
      %c0_24 = arith.constant 0 : index
      %c0_25 = arith.constant 0 : index
      %37 = vector.load %arg9[%c0_23, %c0_24, %c0_25] : memref<1x29x1xf32, #tpu.memory_space<vmem>>, vector<1x29x1xf32>
      %38 = vector.shape_cast %37 : vector<1x29x1xf32> to vector<29x1xf32>
      %39 = arith.maximumf %38, %30 : vector<29x1xf32>
      %c0_26 = arith.constant 0 : index
      %c0_27 = arith.constant 0 : index
      %c0_28 = arith.constant 0 : index
      %40 = vector.load %arg9[%c0_26, %c0_27, %c0_28] : memref<1x29x1xf32, #tpu.memory_space<vmem>>, vector<1x29x1xf32>
      %41 = vector.shape_cast %40 : vector<1x29x1xf32> to vector<29x1xf32>
      %42 = vector.shape_cast %39 : vector<29x1xf32> to vector<1x29x1xf32>
      tpu.vector_store %arg9[%c0_26, %c0_27, %c0_28], %42 {strides = array<i32>} : memref<1x29x1xf32, #tpu.memory_space<vmem>>, vector<1x29x1xf32>,
    } else {
    }
    return
  }
  func.func @transform_0(%arg0: i32, %arg1: i32) -> (i32, i32, i32) {
    %c0_i32 = arith.constant 0 : i32
    %c0_i32_0 = arith.constant 0 : i32
    return %arg0, %c0_i32, %arg1 : i32, i32, i32
  }
  func.func @transform_1(%arg0: i32, %arg1: i32) -> (i32, i32) {
    %c0_i32 = arith.constant 0 : i32
    %c0_i32_0 = arith.constant 0 : i32
    %c0_i32_1 = arith.constant 0 : i32
    return %c0_i32, %c0_i32_0 : i32, i32
  }
  func.func @transform_2(%arg0: i32, %arg1: i32) -> (i32, i32) {
    %c0_i32 = arith.constant 0 : i32
    %c0_i32_0 = arith.constant 0 : i32
    %c0_i32_1 = arith.constant 0 : i32
    return %c0_i32, %c0_i32_0 : i32, i32
  }
  func.func @transform_3(%arg0: i32, %arg1: i32) -> (i32, i32) {
    %c0_i32 = arith.constant 0 : i32
    %c0_i32_0 = arith.constant 0 : i32
    %c0_i32_1 = arith.constant 0 : i32
    return %c0_i32, %c0_i32_0 : i32, i32
  }
  func.func @transform_4(%arg0: i32, %arg1: i32) -> (i32, i32) {
    %c0_i32 = arith.constant 0 : i32
    %c0_i32_0 = arith.constant 0 : i32
    %c0_i32_1 = arith.constant 0 : i32
    return %c0_i32, %c0_i32_0 : i32, i32
  }
  func.func @transform_5(%arg0: i32, %arg1: i32) -> (i32, i32) {
    %c0_i32 = arith.constant 0 : i32
    %c0_i32_0 = arith.constant 0 : i32
    %c0_i32_1 = arith.constant 0 : i32
    return %c0_i32, %c0_i32_0 : i32, i32
  }
  func.func @transform_6(%arg0: i32, %arg1: i32) -> (i32, i32) {
    %c0_i32 = arith.constant 0 : i32
    %c0_i32_0 = arith.constant 0 : i32
    %c0_i32_1 = arith.constant 0 : i32
    return %c0_i32, %c0_i32_0 : i32, i32
  }
  func.func @transform_7(%arg0: i32, %arg1: i32) -> (i32, i32, i32) {
    %c0_i32 = arith.constant 0 : i32
    %c0_i32_0 = arith.constant 0 : i32
    %c0_i32_1 = arith.constant 0 : i32
    return %arg0, %c0_i32, %c0_i32_0 : i32, i32, i32
  }
}

</mosaic_0001>

<bundles_post_ra>
// kernel: tpu_custom_call.1
= control target key start
LH: loop header
LB: loop body
LE: loop exit
PB: predicated region body
PF: predicated region fallthrough
CT: control target
= control target key end

     0   :  { %s2491_s0 = inlined_call_operand.hbm [shape: f32[2,8,384], index: 0, kind: input, shape index: {}]   ;;  %s2492_s1 = inlined_call_operand.hbm [shape: f32[64,8], index: 1, kind: input, shape index: {}]   ;;  %s2493_s2 = inlined_call_operand.hbm [shape: f32[64,1], index: 2, kind: input, shape index: {}]   ;;  %s2494_s3 = inlined_call_operand.hbm [shape: f32[128,64], index: 3, kind: input, shape index: {}]   ;;  %s2495_s4 = inlined_call_operand.hbm [shape: f32[128,1], index: 4, kind: input, shape index: {}]   ;;  %s2496_s5 = inlined_call_operand.hbm [shape: f32[29,128], index: 5, kind: input, shape index: {}]   ;;  %s2497_s6 = inlined_call_operand.hbm [shape: f32[29,1], index: 6, kind: input, shape index: {}]   ;;  %s2498_s7 = inlined_call_operand.hbm [shape: f32[2,29,1], index: 7, kind: output, shape index: {}]  }
   0x1   :  { %2508 = sst [smem:[#allocation24_spill]] %s2491_s0 }
   0x2   :  { %2509 = sst [smem:[#allocation25_spill]] %s2492_s1 }
   0x3   :  { %2510 = sst [smem:[#allocation26_spill]] %s2493_s2 }
   0x4   :  { %2511 = sst [smem:[#allocation27_spill]] %s2494_s3 }
   0x5   :  { %2512 = sst [smem:[#allocation28_spill]] %s2495_s4 }
   0x6   :  { %2513 = sst [smem:[#allocation29_spill]] %s2498_s7 }
   0x7   :  { %12 = vsyncpa [#allocation3], 0 }
   0x8   :  { %14 = vsyncpa [#allocation3 + $0x1], 0 }
   0x9   :  { %15 = vsyncpa [#allocation6], 0 }
   0xa   :  { %16 = vsyncpa [#allocation9], 0 }
   0xb   :  { %17 = vsyncpa [#allocation12], 0 }
   0xc   :  { %18 = vsyncpa [#allocation4], 0 }
   0xd   :  { %20 = vsyncpa [#allocation4 + $0x1], 0  ;;  %s2037_s24 = smov 0   ;;  %s2039_s25 = smov 0  }
   0xe   :  { %s2041_s26 = smov 0   ;;  %s2043_s27 = smov 0  }
   0xf   :  { %s2045_s28 = smov 0   ;;  %s2047_s29 = smov 0  }
  0x10   :  { %s2049_s30 = smov 0   ;;  %s2051_s8 = smov 0  }
  0x11   :  { %s2053_s9 = smov 0   ;;  %s2055_s10 = smov 0  }
  0x12   :  { %s2057_s11 = smov 0  }
  0x13 LB: > { %2514 = sst [smem:[#allocation20_spill]] %s1942_s24  ;;  %s2499_s12 = sadd.s32 4294967295, %s1982_s11   ;;  %s1982_s11 = sphi %s2057_s11, %s26_s11   ;;  %s1978_s10 = sphi %s2055_s10, %s2554_s10   ;;  %s1974_s9 = sphi %s2053_s9, %s2553_s9   ;;  %s1970_s8 = sphi %s2051_s8, %s2552_s8   ;;  %s1966_s30 = sphi %s2049_s30, %s2551_s30   ;;  %s1962_s29 = sphi %s2047_s29, %s2550_s29   ;;  %s1958_s28 = sphi %s2045_s28, %s2549_s28   ;;  %s1954_s27 = sphi %s2043_s27, %s2548_s27   ;;  %s1950_s26 = sphi %s2041_s26, %s2547_s26   ;;  %s1946_s25 = sphi %s2039_s25, %s2546_s25   ;;  %s1942_s24 = sphi %s2037_s24, %s2545_s24  }
  0x14   : > { %2515 = sst [smem:[#allocation21_spill]] %s1966_s30  ;;  %p1234_p0 = scmp.ge.s32.totalorder %s1982_s11, 1 }
  0x15   : > { %2516 = sst [smem:[#allocation22_spill]] %s1970_s8  ;;  %p2096_p1 = scmp.eq.s32.totalorder %s2499_s12, 0 }
  0x16   : > { %p223_p2 = scmp.lt.s32.totalorder %s1982_s11, 7  ;;  %s1984_s15 = smov [#allocation5]  }
  0x17   : > { %s2517_s13 = scalar_select %p2096_p1, 1, 0 }
  0x18   : > { %p2101_p3 = pnand %p1234_p0, %p223_p2  ;;  %s235_s16 = sshll.u32 %s1984_s15, 4  ;;  %s2105_s16 = int_to_ptr.vmem [resolvable:$true] %s235_s16 }
  0x19   : > { %s1985_s18 = smov [#allocation8]   ;;  %s1986_s20 = smov [#allocation11]  }
  0x1a   : > { %s2518_s14 = scalar_select %p2101_p3, 1, 0 }
  0x1b   : > { %p1508_p4 = pneg %p2101_p3  ;;  %s261_s19 = sshll.u32 %s1985_s18, 4  ;;  %s2115_s19 = int_to_ptr.vmem [resolvable:$true] %s261_s19 }
  0x1c   : > { %2519 = sst [smem:[#allocation23_spill]] %s2518_s14  ;;  %s2117_s21 = sshll.u32 %s1986_s20, 4  ;;  %s288_s21 = int_to_ptr.vmem [resolvable:$true] %s2117_s21 }
  0x1d   : > { %p2111_p5 = pnand %p1508_p4, %p2096_p1  ;;  %s2521_s1 = sld [smem:[#allocation25_spill]] }
  0x1f   : > { %p2127_p7 = pneg %p2111_p5 }
  0x23   : > { %s1650_s15 = scalar_lea.hbm %s2521_s1, 1024 }
  0x24   : > { %p1651_p6 = scmp.ne.s32.totalorder %s2521_s1, %s1650_s15  ;;  %p1657_p10 = scmp.lt.u32.totalorder %s1650_s15, %s2521_s1 }
  0x26   : > { %p1653_p8 = pnand %p2127_p7, %p1651_p6 }
  0x28   : > { %p1654_p9 = pneg %p1653_p8 }
  0x2a   : > { %p1659_p11 = pnand %p1657_p10, %p1654_p9 }
  0x2c   : > { %1662 = shalt.err (!%p1659_p11)
}
  0x2d   : > { %s1663_s7 = scalar_lea.vmem %s2105_s16, 1024  ;;  %p1671_p2 = scmp.lt.s32.totalorder %s2105_s16, %s2105_s16 }
  0x2e   : > { %p1664_p12 = scmp.ne.s32.totalorder %s2105_s16, %s1663_s7  ;;  %p1672_p4 = scmp.lt.s32.totalorder %s1663_s7, %s1663_s7 }
  0x30   : > { %p1666_p13 = pnand %p1664_p12, %p2127_p7  ;;  %p1673_p6 = por %p1672_p4, %p1671_p2 }
  0x32   : > { %p1667_p0 = pneg %p1666_p13 }
  0x34   : > { %p1674_p8 = pnand %p1673_p6, %p1667_p0 }
  0x36   : > { %1677 = shalt.err (!%p1674_p8)
}
  0x37   : > { %s1987_s12 = smov 128   ;;  %s1988_s22 = smov 8  }
  0x38   : > { %1511 = dma.hbm_to_vmem [thread:$0]  (!%p2111_p5), %s2521_s1, 1024, %s2105_s16, [#allocation6], %s1987_s12, %s1987_s12, %s1988_s22  }
  0x39   : > { %s2523_s3 = sld [smem:[#allocation27_spill]] }
  0x3f   : > { %s1678_s7 = scalar_lea.hbm %s2523_s3, 2048 }
  0x40   : > { %p1679_p9 = scmp.ne.s32.totalorder %s2523_s3, %s1678_s7  ;;  %p1685_p12 = scmp.lt.u32.totalorder %s1678_s7, %s2523_s3 }
  0x42   : > { %p1681_p10 = pnand %p1679_p9, %p2127_p7 }
  0x44   : > { %p1682_p11 = pneg %p1681_p10 }
  0x46   : > { %p1687_p13 = pnand %p1685_p12, %p1682_p11 }
  0x48   : > { %1690 = shalt.err (!%p1687_p13)
}
  0x49   : > { %s1691_s16 = scalar_lea.vmem %s2115_s19, 2048  ;;  %p1699_p6 = scmp.lt.s32.totalorder %s2115_s19, %s2115_s19 }
  0x4a   : > { %p1692_p0 = scmp.ne.s32.totalorder %s2115_s19, %s1691_s16  ;;  %p1700_p8 = scmp.lt.s32.totalorder %s1691_s16, %s1691_s16 }
  0x4c   : > { %p1694_p2 = pnand %p1692_p0, %p2127_p7  ;;  %p1701_p9 = por %p1700_p8, %p1699_p6 }
  0x4e   : > { %p1695_p4 = pneg %p1694_p2 }
  0x50   : > { %p1702_p10 = pnand %p1701_p9, %p1695_p4 }
  0x52   : > { %1705 = shalt.err (!%p1702_p10)
}
  0x53   : > { %1517 = dma.hbm_to_vmem [thread:$0]  (!%p2111_p5), %s2523_s3, 2048, %s2115_s19, [#allocation9], %s1987_s12, %s1987_s12, %s1988_s22  }
  0x54   : > { %s1706_s23 = scalar_lea.hbm %s2496_s5, 512 }
  0x55   : > { %p1707_p11 = scmp.ne.s32.totalorder %s2496_s5, %s1706_s23  ;;  %p1713_p0 = scmp.lt.u32.totalorder %s1706_s23, %s2496_s5 }
  0x57   : > { %p1709_p12 = pnand %p1707_p11, %p2127_p7 }
  0x59   : > { %p1710_p13 = pneg %p1709_p12 }
  0x5b   : > { %p1715_p2 = pnand %p1713_p0, %p1710_p13 }
  0x5d   : > { %1718 = shalt.err (!%p1715_p2)
}
  0x5e   : > { %s1719_s16 = scalar_lea.vmem %s288_s21, 512  ;;  %p1727_p9 = scmp.lt.s32.totalorder %s288_s21, %s288_s21 }
  0x5f   : > { %p1720_p4 = scmp.ne.s32.totalorder %s288_s21, %s1719_s16  ;;  %p1728_p10 = scmp.lt.s32.totalorder %s1719_s16, %s1719_s16 }
  0x61   : > { %p1722_p6 = pnand %p1720_p4, %p2127_p7  ;;  %p1729_p3 = por %p1728_p10, %p1727_p9 }
  0x63   : > { %p1723_p8 = pneg %p1722_p6 }
  0x65   : > { %p1730_p1 = pnand %p1729_p3, %p1723_p8 }
  0x67   : > { %1733 = shalt.err (!%p1730_p1)
}
  0x68   : > { %1523 = dma.hbm_to_vmem [thread:$0]  (!%p2111_p5), %s2496_s5, 512, %s288_s21, [#allocation12], %s1987_s12, %s1987_s12, %s1988_s22  }
  0x69   : > { %s1989_s24 = smov [#allocation7]   ;;  %s1990_s14 = smov [#allocation10]  }
  0x6a   : > { %s248_s30 = sshll.u32 %s1989_s24, 4  ;;  %s274_s23 = sshll.u32 %s1990_s14, 4  ;;  %s249_s30 = int_to_ptr.vmem [resolvable:$true] %s248_s30  ;;  %s275_s23 = int_to_ptr.vmem [resolvable:$true] %s274_s23 }
  0x6b   : > { %s2524_s2 = sld [smem:[#allocation26_spill]] }
  0x71   : > { %s1734_s20 = scalar_lea.hbm %s2524_s2, 1024 }
  0x72   : > { %p1735_p1 = scmp.ne.s32.totalorder %s2524_s2, %s1734_s20  ;;  %p1741_p12 = scmp.lt.u32.totalorder %s1734_s20, %s2524_s2 }
  0x74   : > { %p1737_p3 = pnand %p1735_p1, %p2127_p7 }
  0x76   : > { %p1738_p11 = pneg %p1737_p3 }
  0x78   : > { %p1743_p13 = pnand %p1741_p12, %p1738_p11 }
  0x7a   : > { %1746 = shalt.err (!%p1743_p13)
}
  0x7b   : > { %s1747_s21 = scalar_lea.vmem %s249_s30, 1024  ;;  %p1755_p6 = scmp.lt.s32.totalorder %s249_s30, %s249_s30 }
  0x7c   : > { %p1748_p0 = scmp.ne.s32.totalorder %s249_s30, %s1747_s21  ;;  %p1756_p8 = scmp.lt.s32.totalorder %s1747_s21, %s1747_s21 }
  0x7e   : > { %p1750_p2 = pnand %p1748_p0, %p2127_p7  ;;  %p1757_p9 = por %p1756_p8, %p1755_p6 }
  0x80   : > { %p1751_p4 = pneg %p1750_p2 }
  0x82   : > { %p1758_p10 = pnand %p1757_p9, %p1751_p4 }
  0x84   : > { %1761 = shalt.err (!%p1758_p10)
}
  0x85   : > { %1514 = dma.hbm_to_vmem [thread:$0]  (!%p2111_p5), %s2524_s2, 1024, %s249_s30, [#allocation6], %s1987_s12, %s1987_s12, %s1988_s22  }
  0x86   : > { %s2525_s4 = sld [smem:[#allocation28_spill]] }
  0x8c   : > { %s1762_s15 = scalar_lea.hbm %s2525_s4, 2048 }
  0x8d   : > { %p1763_p1 = scmp.ne.s32.totalorder %s2525_s4, %s1762_s15  ;;  %p1769_p12 = scmp.lt.u32.totalorder %s1762_s15, %s2525_s4 }
  0x8f   : > { %p1765_p3 = pnand %p1763_p1, %p2127_p7 }
  0x91   : > { %p1766_p11 = pneg %p1765_p3 }
  0x93   : > { %p1771_p13 = pnand %p1769_p12, %p1766_p11 }
  0x95   : > { %1774 = shalt.err (!%p1771_p13)
}
  0x96   : > { %s1775_s19 = scalar_lea.vmem %s275_s23, 2048  ;;  %p1783_p6 = scmp.lt.s32.totalorder %s275_s23, %s275_s23 }
  0x97   : > { %p1776_p0 = scmp.ne.s32.totalorder %s275_s23, %s1775_s19  ;;  %p1784_p8 = scmp.lt.s32.totalorder %s1775_s19, %s1775_s19 }
  0x99   : > { %p1778_p2 = pnand %p1776_p0, %p2127_p7  ;;  %p1785_p9 = por %p1784_p8, %p1783_p6 }
  0x9b   : > { %p1779_p4 = pneg %p1778_p2 }
  0x9d   : > { %p1786_p10 = pnand %p1785_p9, %p1779_p4 }
  0x9f   : > { %1789 = shalt.err (!%p1786_p10)
}
  0xa0   : > { %1520 = dma.hbm_to_vmem [thread:$0]  (!%p2111_p5), %s2525_s4, 2048, %s275_s23, [#allocation9], %s1987_s12, %s1987_s12, %s1988_s22  }
  0xa1   : > { %s1991_s1 = smov [#allocation13]   ;;  %s1790_s15 = scalar_lea.hbm %s2497_s6, 512 }
  0xa2   : > { %s300_s0 = sshll.u32 %s1991_s1, 4  ;;  %p1791_p1 = scmp.ne.s32.totalorder %s2497_s6, %s1790_s15  ;;  %s301_s0 = int_to_ptr.vmem [resolvable:$true] %s300_s0 }
  0xa3   : > { %p1797_p12 = scmp.lt.u32.totalorder %s1790_s15, %s2497_s6 }
  0xa4   : > { %p1793_p3 = pnand %p1791_p1, %p2127_p7 }
  0xa6   : > { %p1794_p11 = pneg %p1793_p3 }
  0xa8   : > { %p1799_p13 = pnand %p1797_p12, %p1794_p11 }
  0xaa   : > { %1802 = shalt.err (!%p1799_p13)
}
  0xab   : > { %s1803_s23 = scalar_lea.vmem %s301_s0, 512  ;;  %p1811_p6 = scmp.lt.s32.totalorder %s301_s0, %s301_s0 }
  0xac   : > { %p1804_p0 = scmp.ne.s32.totalorder %s301_s0, %s1803_s23  ;;  %p1812_p8 = scmp.lt.s32.totalorder %s1803_s23, %s1803_s23 }
  0xae   : > { %p1806_p2 = pnand %p1804_p0, %p2127_p7  ;;  %p1813_p9 = por %p1812_p8, %p1811_p6 }
  0xb0   : > { %p1807_p4 = pneg %p1806_p2 }
  0xb2   : > { %p1814_p10 = pnand %p1813_p9, %p1807_p4 }
  0xb4   : > { %1817 = shalt.err (!%p1814_p10)
}
  0xb5   : > { %1526 = dma.hbm_to_vmem [thread:$0]  (!%p2111_p5), %s2497_s6, 512, %s301_s0, [#allocation12], %s1987_s12, %s1987_s12, %s1988_s22  }
  0xb6   : > { %s1233_s8 = sadd.s32 4294967294, %s1982_s11   ;;  %s35_s17 = sadd.s32 1, %s1974_s9 }
  0xb7   : > { %p36_p7 = scmp.ge.s32.totalorder %s35_s17, 3  ;;  %s38_s21 = sadd.s32 1, %s1978_s10 }
  0xb8   : > { %s47_s1 = sadd.s32 1, %s1962_s29  ;;  %p54_p1 = scmp.ne.s32.totalorder %s1962_s29, %s1958_s28 }
  0xb9   : > { %s2556_s17 = smov (%p36_p7, %s35_s17), 0  ;;  %s2558_s21 = smov (!%p36_p7, %s38_s21), %s1978_s10 }
  0xba   : > { %s43_s24 = ssub.s32 %s1974_s9, %s2556_s17  ;;  %p55_p3 = scmp.eq.s32.totalorder %s1982_s11, 0 }
  0xbb   : > { %s2526_s12 = sld [smem:[#allocation20_spill]]  ;;  %p40_p5 = scmp.ge.s32.totalorder %s2558_s21, 2 }
  0xbc   : > { %p60_p11 = scmp.ne.s32.totalorder %s1958_s28, %s1954_s27  ;;  %p2276_p12 = por %p55_p3, %p54_p1 }
  0xbd   : > { %s199_s0 = sadd.s32 1, %s1950_s26  ;;  %s2560_s21 = smov (%p40_p5, %s2558_s21), 0 }
  0xbe   : > { %p2528_p13 = scmp.ne.s32.totalorder %s2517_s13, 0  ;;  %p209_p2 = scmp.ne.s32.totalorder %s1950_s26, %s1946_s25 }
  0xbf   : > { %s42_s15 = ssub.s32 %s1978_s10, %s2560_s21  ;;  %s2530_s27 = sadd.s32 4294967295, %s1982_s11  }
  0xc0   : > { %p2285_p0 = por %p2528_p13, %p60_p11  ;;  %p210_p4 = scmp.eq.s32.totalorder %s2530_s27, 5 }
  0xc1   : > { %s44_s18 = sor.u32 %s43_s24, %s42_s15  ;;  %p197_p6 = scmp.eq.s32.totalorder %s42_s15, 0 }
  0xc2   : > { %p45_p8 = scmp.eq.s32.totalorder %s44_s18, 0  ;;  %p2295_p9 = por %p210_p4, %p209_p2 }
  0xc3   : > { %s2300_s7 = scalar_select %p197_p6, %s1950_s26, %s199_s0  }
  0xc4   : > { %s2531_s20 = scalar_select %p2295_p9, 1, 0 }
  0xc5   : > { %s2303_s16 = scalar_select %p45_p8, %s1962_s29, %s47_s1  }
  0xc6   : > { %p215_p10 = scmp.ne.s32.totalorder %s1946_s25, %s2526_s12  ;;  %p216_p7 = scmp.eq.s32.totalorder %s1233_s8, 5 }
  0xc7   : > { %p1541_p1 = scmp.lt.s32.totalorder %s1982_s11, 6  ;;  %s314_s23 = sand.u32 1, %s1962_s29  }
  0xc8   : > { %p2309_p3 = por %p216_p7, %p215_p10  ;;  %s1242_s30 = sshll.u32 %s314_s23, 3 }
  0xc9   : > { %s1479_s24 = smul.u32 3, %s1978_s10  ;;  %p2316_p5 = pnand %p1541_p1, %p2276_p12 }
  0xca   : > { %s2532_s19 = scalar_select %p2309_p3, 1, 0 }
  0xcb   : > { %s323_s0 = sadd.s32 %s1974_s9, %s1479_s24  ;;  %s318_s1 = scalar_lea.vmem [#allocation2], %s1242_s30 }
  0xcc   : > { %s327_s27 = sshll.u32 %s318_s1, 4  ;;  %s1243_s12 = sshll.u32 %s323_s0, 7  ;;  %s2321_s27 = int_to_ptr.vmem [resolvable:$true] %s327_s27 }
  0xcd   : > { %s2534_s2 = sld [smem:[#allocation24_spill]]  ;;  %s315_s22 = scalar_lea.sflag [#allocation3], %s314_s23 }
  0xce   : > { %p1820_p12 = pneg %p2316_p5 }
  0xd3   : > { %s2326_s3 = scalar_lea.hbm %s2534_s2, %s1243_s12  ;;  %s1823_s0 = scalar_lea.hbm %s2534_s2, 768 }
  0xd4   : > { %s1818_s4 = scalar_lea.hbm %s2326_s3, 128  ;;  %p1824_p4 = scmp.lt.u32.totalorder %s2326_s3, %s2534_s2 }
  0xd5   : > { %p1819_p11 = scmp.ne.s32.totalorder %s2326_s3, %s1818_s4  ;;  %p1825_p6 = scmp.lt.u32.totalorder %s1823_s0, %s1818_s4 }
  0xd6   : > { %p1827_p10 = scmp.lt.u32.totalorder %s1818_s4, %s2326_s3 }
  0xd7   : > { %p1821_p13 = pnand %p1820_p12, %p1819_p11  ;;  %p1826_p8 = por %p1825_p6, %p1824_p4 }
  0xd9   : > { %p1822_p2 = pneg %p1821_p13  ;;  %p1828_p7 = por %p1827_p10, %p1826_p8 }
  0xdb   : > { %p1829_p1 = pnand %p1828_p7, %p1822_p2 }
  0xdd   : > { %1832 = shalt.err (!%p1829_p1)
}
  0xde   : > { %s1833_s23 = scalar_lea.vmem %s2321_s27, 128  ;;  %s1992_s8 = smov [#allocation2]  }
  0xdf   : > { %p1834_p11 = scmp.ne.s32.totalorder %s2321_s27, %s1833_s23  ;;  %s1838_s18 = sshll.u32 %s1992_s8, 4  ;;  %s1839_s18 = int_to_ptr.vmem [resolvable:$false] %s1838_s18 }
  0xe0   : > { %s1840_s30 = scalar_lea.vmem %s1839_s18, 256  ;;  %p1841_p9 = scmp.lt.s32.totalorder %s2321_s27, %s1839_s18 }
  0xe1   : > { %p1836_p13 = pnand %p1834_p11, %p1820_p12  ;;  %p1842_p4 = scmp.lt.s32.totalorder %s1840_s30, %s1833_s23 }
  0xe3   : > { %p1837_p3 = pneg %p1836_p13  ;;  %p1843_p6 = por %p1842_p4, %p1841_p9 }
  0xe5   : > { %p1844_p8 = pnand %p1843_p6, %p1837_p3 }
  0xe7   : > { %1847 = shalt.err (!%p1844_p8)
}
  0xe8   : > { %1530 = dma.hbm_to_vmem [thread:$0]  (!%p2316_p5), %s2326_s3, 128, %s2321_s27, %s315_s22  }
  0xe9   : > { %s2535_s4 = sld [smem:[#allocation23_spill]] }
  0xef   : > { %p2536_p2 = scmp.ne.s32.totalorder %s2535_s4, 0 }
  0xf0   : > { %s338_s24 = sand.u32 (!%p2536_p2), 1, %s1958_s28  }
  0xf1   : > { %336 = sbr.rel (%p2536_p2) target bundleno = 1156 (0x484), region = 48  ;;  %s1245_s0 = sshll.u32 (!%p2536_p2), %s338_s24, 3 }
  0xf2   : > { %s339_s1 = scalar_lea.sflag (!%p2536_p2), [#allocation3], %s338_s24  ;;  %s342_s12 = scalar_lea.vmem (!%p2536_p2), [#allocation2], %s1245_s0 }
  0xf8   : > { %1921 = dma.done.wait (%p2285_p0), %s339_s1, 128  }
  0xf9   : > { %1923 = vsyncadd (%p2285_p0), %s339_s1, 4294967168  ;;  %p2537_p9 = scmp.ne.s32.totalorder %s2517_s13, 0 }
  0xfb   : > { %1925 = dma.done.wait (%p2537_p9), [#allocation6], 2048  }
  0xfc   : > { %1927 = vsyncadd (%p2537_p9), [#allocation6], 4294965248 }
  0xfd   : > { %1929 = dma.done.wait (%p2537_p9), [#allocation9], 4096  }
  0xfe   : > { %1931 = vsyncadd (%p2537_p9), [#allocation9], 4294963200 }
  0xff   : > { %1933 = dma.done.wait (%p2537_p9), [#allocation12], 1024  }
 0x100   : > { %1935 = vsyncadd (%p2537_p9), [#allocation12], 4294966272  ;;  %s394_s3 = sand.u32 1, %s1946_s25   ;;  %v1993_v0 = vmov 0   ;;  %vm454_vm0 = vcmask 64512   ;;  %v397_v1 = vld [vmem:[%s342_s12] sm:$0xff] }
 0x101   : > { %s2375_s14 = sshll.u32 %s394_s3, 5  ;;  %1648 = vset.pattern.permute.xlu0 %v1993_v0  ;;  %1649 = vset.pattern.permute.xlu1 %v1993_v0  ;;  %v398_v2 = vld [vmem:[#allocation5] sm:$0xff]  ;;  %v399_v3 = vld [vmem:[#allocation5 + $0x8] sm:$0xff]  ;;  %v400_v4 = vld [vmem:[#allocation5 + $0x10] sm:$0xff]  ;;  %vm704_vm1 = vcmask 523264   ;;  %s2538_s13 = sld [smem:[#allocation21_spill]] }
 0x102   : > { %1339 = vmatprep.subr.mxu0 %v397_v1  ;;  %1341 = vmatprep.mubr.msk.f32.mxu0 %vm454_vm0, %v398_v2  ;;  %v406_v5 = vld [vmem:[#allocation7] sm:$0xff]  ;;  %v408_v6 = vld [vmem:[#allocation7 + $0x10] sm:$0xff]  ;;  %v401_v7 = vld [vmem:[#allocation5 + $0x18] sm:$0xff]  ;;  %vm1043_vm3 = vcmask 1044480   ;;  %s2403_s27 = scalar_lea.vmem [#allocation14], %s2375_s14 }
 0x103   : > { %1340 = vmatpush3.msra.mxu0 %v397_v1  ;;  %416 = vperm.xlu0 %1648, %v406_v5   ;;  %v402_v8 = vld [vmem:[#allocation5 + $0x20] sm:$0xff]  ;;  %v407_v9 = vld [vmem:[#allocation7 + $0x8] sm:$0xff]  ;;  %v409_v10 = vld [vmem:[#allocation7 + $0x18] sm:$0xff] }
 0x104   : > { %1342 = vmatmul.mubr.msk.f32.vlgmr.msra.gmra.mrb[0].mxu0 %vm454_vm0, %v399_v3  ;;  %426 = vperm.xlu1 %1649, %v408_v6   ;;  %v403_v11 = vld [vmem:[#allocation5 + $0x28] sm:$0xff]  ;;  %v404_v12 = vld [vmem:[#allocation5 + $0x30] sm:$0xff]  ;;  %v410_v13 = vld [vmem:[#allocation7 + $0x20] sm:$0xff] }
 0x105   : > { %1344 = vmatprep.mubr.msk.f32.mxu0 %vm454_vm0, %v400_v4  ;;  %v411_v14 = vld [vmem:[#allocation7 + $0x28] sm:$0xff]  ;;  %v405_v15 = vld [vmem:[#allocation5 + $0x38] sm:$0xff]  ;;  %v412_v16 = vld [vmem:[#allocation7 + $0x30] sm:$0xff] }
 0x106   : > { %v413_v17 = vld [vmem:[#allocation7 + $0x38] sm:$0xff]  ;;  %v608_v18 = vld [vmem:[#allocation10] sm:$0xff]  ;;  %v609_v19 = vld [vmem:[#allocation10 + $0x8] sm:$0xff] }
 0x107   : > { %421 = vperm.xlu0 %1648, %v407_v9   ;;  %v610_v20 = vld [vmem:[#allocation10 + $0x10] sm:$0xff]  ;;  %v611_v21 = vld [vmem:[#allocation10 + $0x18] sm:$0xff]  ;;  %v612_v22 = vld [vmem:[#allocation10 + $0x20] sm:$0xff]  ;;  %s1277_s15 = sshll.u32 %s2538_s13, 7  ;;  %p1278_p0 = scmp.ne.s32.totalorder %s2538_s13, 0 }
 0x108   : > { %1345 = vmatmul.mubr.msk.f32.gmra.mrb[2].mxu0 %vm454_vm0, %v401_v7  ;;  %431 = vperm.xlu1 %1649, %v409_v10   ;;  %v613_v23 = vld [vmem:[#allocation10 + $0x28] sm:$0xff]  ;;  %v614_v24 = vld [vmem:[#allocation10 + $0x30] sm:$0xff]  ;;  %v615_v25 = vld [vmem:[#allocation10 + $0x38] sm:$0xff]  ;;  %vm1051_vm4 = vcmask (!%p1278_p0), 7168   ;;  %vm1055_vm5 = vcmask (!%p1278_p0), 4096  }
 0x109   : > { %1347 = vmatprep.mubr.msk.f32.mxu0 %vm454_vm0, %v402_v8  ;;  %v616_v26 = vld [vmem:[#allocation10 + $0x40] sm:$0xff]  ;;  %v617_v27 = vld [vmem:[#allocation10 + $0x48] sm:$0xff]  ;;  %v618_v28 = vld [vmem:[#allocation10 + $0x50] sm:$0xff] }
 0x10a   : > { %v619_v29 = vld [vmem:[#allocation10 + $0x58] sm:$0xff]  ;;  %v620_v30 = vld [vmem:[#allocation10 + $0x60] sm:$0xff]  ;;  %v621_v31 = vld [vmem:[#allocation10 + $0x68] sm:$0xff] }
 0x10b   : > { %436 = vperm.xlu0 %1648, %v410_v13   ;;  %v622_v32 = vld [vmem:[#allocation10 + $0x70] sm:$0xff]  ;;  %v623_v33 = vld [vmem:[#allocation10 + $0x78] sm:$0xff]  ;;  %v918_v35 = vld [vmem:[#allocation13] sm:$0xff] }
 0x10c   : > { %1348 = vmatmul.mubr.msk.f32.gmra.mrb[4].mxu0 %vm454_vm0, %v403_v11  ;;  %441 = vperm.xlu1 %1649, %v411_v14   ;;  %v921_v34 = vld [vmem:[#allocation13 + $0x18] sm:$0x1f]  ;;  %v919_v36 = vld [vmem:[#allocation13 + $0x8] sm:$0xff]  ;;  %v920_v37 = vld [vmem:[#allocation13 + $0x10] sm:$0xff] }
 0x10d   : > { %1350 = vmatprep.mubr.msk.f32.mxu0 %vm454_vm0, %v404_v12  ;;  %v592_v38 = vld [vmem:[#allocation8] sm:$0xff]  ;;  %v593_v11 = vld [vmem:[#allocation8 + $0x8] sm:$0xff]  ;;  %v594_v12 = vld [vmem:[#allocation8 + $0x10] sm:$0xff] }
 0x10e   : > { %1369 = vmatprep.mubr.msk.f32.mxu1 %vm704_vm1, %v592_v38  ;;  %v595_v13 = vld [vmem:[#allocation8 + $0x18] sm:$0xff]  ;;  %v596_v14 = vld [vmem:[#allocation8 + $0x20] sm:$0xff] }
 0x10f   : > { %446 = vperm.xlu0 %1648, %v412_v16   ;;  %v598_v16 = vld [vmem:[#allocation8 + $0x30] sm:$0xff] }
 0x110   : > { %1351 = vmatmul.mubr.msk.f32.gmra.mrb[6].mxu0 %vm454_vm0, %v405_v15  ;;  %451 = vperm.xlu1 %1649, %v413_v17   ;;  %v597_v15 = vld [vmem:[#allocation8 + $0x28] sm:$0xff]  ;;  %v599_v17 = vld [vmem:[#allocation8 + $0x38] sm:$0xff] }
 0x113   : > { %626 = vperm.xlu0 %1648, %v608_v18   ;;  %v600_v18 = vld [vmem:[#allocation8 + $0x40] sm:$0xff] }
 0x114   : > { %631 = vperm.xlu1 %1649, %v609_v19   ;;  %v601_v19 = vld [vmem:[#allocation8 + $0x48] sm:$0xff] }
 0x117   : > { %636 = vperm.xlu0 %1648, %v610_v20   ;;  %v602_v20 = vld [vmem:[#allocation8 + $0x50] sm:$0xff] }
 0x118   : > { %641 = vperm.xlu1 %1649, %v611_v21   ;;  %v603_v21 = vld [vmem:[#allocation8 + $0x58] sm:$0xff] }
 0x11b   : > { %646 = vperm.xlu0 %1648, %v612_v22   ;;  %v604_v22 = vld [vmem:[#allocation8 + $0x60] sm:$0xff] }
 0x11c   : > { %651 = vperm.xlu1 %1649, %v613_v23   ;;  %v605_v23 = vld [vmem:[#allocation8 + $0x68] sm:$0xff] }
 0x11f   : > { %656 = vperm.xlu0 %1648, %v614_v24   ;;  %v606_v24 = vld [vmem:[#allocation8 + $0x70] sm:$0xff] }
 0x120   : > { %661 = vperm.xlu1 %1649, %v615_v25   ;;  %v607_v25 = vld [vmem:[#allocation8 + $0x78] sm:$0xff] }
 0x123   : > { %666 = vperm.xlu0 %1648, %v616_v26   ;;  %v914_v26 = vld [vmem:[#allocation11] sm:$0xff] }
 0x124   : > { %671 = vperm.xlu1 %1649, %v617_v27   ;;  %1425 = vmatprep.mubr.f32.mxu0 %v914_v26 }
 0x127   : > { %676 = vperm.xlu0 %1648, %v618_v28  }
 0x128   : > { %681 = vperm.xlu1 %1649, %v619_v29  }
 0x12b   : > { %686 = vperm.xlu0 %1648, %v620_v30  }
 0x12c   : > { %691 = vperm.xlu1 %1649, %v621_v31  }
 0x12f   : > { %696 = vperm.xlu0 %1648, %v622_v32  }
 0x130   : > { %701 = vperm.xlu1 %1649, %v623_v33  }
 0x133   : > { %939 = vperm.xlu0 %1648, %v921_v34  }
 0x134   : > { %924 = vperm.xlu1 %1649, %v918_v35  }
 0x137   : > { %929 = vperm.xlu0 %1648, %v919_v36  }
 0x138   : > { %934 = vperm.xlu1 %1649, %v920_v37  }
 0x182   : > { %v417_v39 = vpop.permute.xlu0 %416 }
 0x183   : > { %v427_v40 = vpop.permute.xlu1 %426 }
 0x186   : > { %v422_v41 = vpop.permute.xlu0 %421 }
 0x187   : > { %v432_v42 = vpop.permute.xlu1 %431 }
 0x18a   : > { %v437_v55 = vpop.permute.xlu0 %436 }
 0x18b   : > { %v442_v52 = vpop.permute.xlu1 %441 }
 0x18e   : > { %v447_v3 = vpop.permute.xlu0 %446 }
 0x18f   : > { %v452_v0 = vpop.permute.xlu1 %451 }
 0x192   : > { %v627_v28 = vpop.permute.xlu0 %626 }
 0x193   : > { %v632_v27 = vpop.permute.xlu1 %631 }
 0x196   : > { %v637_v30 = vpop.permute.xlu0 %636 }
 0x197   : > { %v642_v29 = vpop.permute.xlu1 %641 }
 0x19a   : > { %v647_v32 = vpop.permute.xlu0 %646 }
 0x19b   : > { %v652_v31 = vpop.permute.xlu1 %651 }
 0x19f   : > { %v662_v38 = vpop.permute.xlu1 %661 }
 0x1d7   : > { %v1343_v43 = vpop.f32.mrb[0].mxu0 }
 0x1d8   : > { %v551_v44 = vadd.f32 %v1343_v43, %v422_v41  ;;  %v545_v45 = vpop.f32.mrb[1].mxu0  ;;  %v657_v41 = vpop.permute.xlu0 %656 }
 0x1d9   : > { %v546_v46 = vadd.f32 %v545_v45, %v417_v39 }
 0x1da   : > { %v585_v47 = vmax.f32 %v551_v44, 0.0 }
 0x1db   : > { %v584_v48 = vmax.f32 %v546_v46, 0.0  ;;  %v1346_v49 = vpop.f32.mrb[2].mxu0 }
 0x1dc   : > { %v561_v50 = vadd.f32 %v1346_v49, %v432_v42  ;;  %v555_v51 = vpop.f32.mrb[3].mxu0 }
 0x1dd   : > { %v556_v53 = vadd.f32 %v555_v51, %v427_v40  ;;  %v1431_v54 = vpack.c.bf16 %v585_v47, %v584_v48  ;;  %v672_v51 = vpop.permute.xlu1 %671 }
 0x1de   : > { %v587_v56 = vmax.f32 %v561_v50, 0.0 }
 0x1df   : > { %v586_v57 = vmax.f32 %v556_v53, 0.0  ;;  %v1349_v58 = vpop.f32.mrb[4].mxu0  ;;  %1432 = vmatprep.subr.bf16.mxu1 %v1431_v54 }
 0x1e0   : > { %v571_v59 = vadd.f32 %v1349_v58, %v442_v52  ;;  %v565_v60 = vpop.f32.mrb[5].mxu0  ;;  %1434 = vmatpush3.bf16.msra.mxu1 %v1431_v54  ;;  %v667_v54 = vpop.permute.xlu0 %666 }
 0x1e1   : > { %v1435_v61 = vpack.c.bf16 %v587_v56, %v586_v57  ;;  %v566_v62 = vadd.f32 %v565_v60, %v437_v55 }
 0x1e2   : > { %v589_v63 = vmax.f32 %v571_v59, 0.0 }
 0x1e3   : > { %v588_v1 = vmax.f32 %v566_v62, 0.0  ;;  %v1352_v2 = vpop.f32.mrb[6].mxu0  ;;  %1436 = vmatprep.subr.bf16.mxu1 %v1435_v61 }
 0x1e4   : > { %v581_v4 = vadd.f32 %v1352_v2, %v452_v0  ;;  %v575_v5 = vpop.f32.mrb[7].mxu0  ;;  %1438 = vmatpush3.bf16.msra.mxu1 %v1435_v61  ;;  %v677_v2 = vpop.permute.xlu0 %676 }
 0x1e5   : > { %v1439_v6 = vpack.c.bf16 %v589_v63, %v588_v1  ;;  %v576_v7 = vadd.f32 %v575_v5, %v447_v3  ;;  %v682_v63 = vpop.permute.xlu1 %681 }
 0x1e6   : > { %v591_v8 = vmax.f32 %v581_v4, 0.0 }
 0x1e7   : > { %v590_v9 = vmax.f32 %v576_v7, 0.0  ;;  %1440 = vmatprep.subr.bf16.mxu1 %v1439_v6 }
 0x1e8   : > { %1442 = vmatpush3.bf16.msra.mxu1 %v1439_v6 }
 0x1e9   : > { %v1443_v10 = vpack.c.bf16 %v591_v8, %v590_v9 }
 0x1eb   : > { %1444 = vmatprep.subr.bf16.mxu1 %v1443_v10 }
 0x1ec   : > { %1446 = vmatpush3.bf16.msra.mxu1 %v1443_v10 }
 0x1ef   : > { %1370 = vmatmul.mubr.msk.f32.vlgmr.msra.gmra.mrb[0].mxu1 %vm704_vm1, %v593_v11 }
 0x1f0   : > { %1372 = vmatprep.mubr.msk.f32.mxu1 %vm704_vm1, %v594_v12  ;;  %v692_v12 = vpop.permute.xlu1 %691 }
 0x1f3   : > { %1373 = vmatmul.mubr.msk.f32.gmra.mrb[2].mxu1 %vm704_vm1, %v595_v13 }
 0x1f4   : > { %1375 = vmatprep.mubr.msk.f32.mxu1 %vm704_vm1, %v596_v14 }
 0x1f7   : > { %1376 = vmatmul.mubr.msk.f32.gmra.mrb[4].mxu1 %vm704_vm1, %v597_v15  ;;  %v687_v15 = vpop.permute.xlu0 %686 }
 0x1f8   : > { %1378 = vmatprep.mubr.msk.f32.mxu1 %vm704_vm1, %v598_v16 }
 0x1fb   : > { %1379 = vmatmul.mubr.msk.f32.gmra.mrb[6].mxu1 %vm704_vm1, %v599_v17 }
 0x1fc   : > { %1381 = vmatprep.mubr.msk.f32.mxu1 %vm704_vm1, %v600_v18 }
 0x1ff   : > { %1382 = vmatmul.mubr.msk.f32.gmra.mrb[8].mxu1 %vm704_vm1, %v601_v19 }
 0x200   : > { %1384 = vmatprep.mubr.msk.f32.mxu1 %vm704_vm1, %v602_v20 }
 0x203   : > { %1385 = vmatmul.mubr.msk.f32.gmra.mrb[10].mxu1 %vm704_vm1, %v603_v21 }
 0x204   : > { %1387 = vmatprep.mubr.msk.f32.mxu1 %vm704_vm1, %v604_v22 }
 0x207   : > { %1388 = vmatmul.mubr.msk.f32.gmra.mrb[12].mxu1 %vm704_vm1, %v605_v23 }
 0x208   : > { %1390 = vmatprep.mubr.msk.f32.mxu1 %vm704_vm1, %v606_v24  ;;  %v702_v24 = vpop.permute.xlu1 %701 }
 0x20b   : > { %1391 = vmatmul.mubr.msk.f32.gmra.mrb[14].mxu1 %vm704_vm1, %v607_v25 }
 0x2c2   : > { %v1371_v33 = vpop.f32.mrb[0].mxu1 }
 0x2c3   : > { %v825_v34 = vadd.f32 %v1371_v33, %v632_v27  ;;  %v819_v35 = vpop.f32.mrb[1].mxu1  ;;  %v697_v27 = vpop.permute.xlu0 %696 }
 0x2c4   : > { %v820_v36 = vadd.f32 %v819_v35, %v627_v28  ;;  %v915_v35 = vld [vmem:[#allocation11 + $0x8] sm:$0xff] }
 0x2c5   : > { %v899_v37 = vmax.f32 %v825_v34, 0.0 }
 0x2c6   : > { %v898_v39 = vmax.f32 %v820_v36, 0.0  ;;  %v1374_v40 = vpop.f32.mrb[2].mxu1  ;;  %v916_v36 = vld [vmem:[#allocation11 + $0x10] sm:$0xff] }
 0x2c7   : > { %v835_v42 = vadd.f32 %v1374_v40, %v642_v29  ;;  %v829_v43 = vpop.f32.mrb[3].mxu1  ;;  %v1030_v40 = vstv %s1277_s15 }
 0x2c8   : > { %v1447_v44 = vpack.c.bf16 %v899_v37, %v898_v39  ;;  %v830_v45 = vadd.f32 %v829_v43, %v637_v30  ;;  %v917_v37 = vld [vmem:[#allocation11 + $0x18] sm:$0x1f]  ;;  %v925_v43 = vpop.permute.xlu1 %924 }
 0x2c9   : > { %v901_v46 = vmax.f32 %v835_v42, 0.0 }
 0x2ca   : > { %v900_v47 = vmax.f32 %v830_v45, 0.0  ;;  %v1377_v48 = vpop.f32.mrb[4].mxu1  ;;  %1448 = vmatprep.subr.bf16.mxu0 %v1447_v44 }
 0x2cb   : > { %v845_v49 = vadd.f32 %v1377_v48, %v652_v31  ;;  %v839_v50 = vpop.f32.mrb[5].mxu1  ;;  %1450 = vmatpush3.bf16.msra.mxu0 %v1447_v44 }
 0x2cc   : > { %v1451_v52 = vpack.c.bf16 %v901_v46, %v900_v47  ;;  %v840_v53 = vadd.f32 %v839_v50, %v647_v32 }
 0x2cd   : > { %v903_v55 = vmax.f32 %v845_v49, 0.0 }
 0x2ce   : > { %v902_v56 = vmax.f32 %v840_v53, 0.0  ;;  %v1380_v57 = vpop.f32.mrb[6].mxu1  ;;  %1452 = vmatprep.subr.bf16.mxu0 %v1451_v52 }
 0x2cf   : > { %v855_v58 = vadd.f32 %v1380_v57, %v662_v38  ;;  %v849_v59 = vpop.f32.mrb[7].mxu1  ;;  %1454 = vmatpush3.bf16.msra.mxu0 %v1451_v52  ;;  %v1027_v38 = vlaneseq  ;;  %v935_v52 = vpop.permute.xlu1 %934 }
 0x2d0   : > { %v1455_v60 = vpack.c.bf16 %v903_v55, %v902_v56  ;;  %v850_v61 = vadd.f32 %v849_v59, %v657_v41  ;;  %v940_v41 = vpop.permute.xlu0 %939 }
 0x2d1   : > { %v905_v62 = vmax.f32 %v855_v58, 0.0  ;;  %v1028_v39 = vand.u32 127, %v1027_v38 }
 0x2d2   : > { %v904_v0 = vmax.f32 %v850_v61, 0.0  ;;  %v1383_v1 = vpop.f32.mrb[8].mxu1  ;;  %1456 = vmatprep.subr.bf16.mxu0 %v1455_v60 }
 0x2d3   : > { %v865_v3 = vadd.f32 %v1383_v1, %v672_v51  ;;  %v859_v4 = vpop.f32.mrb[9].mxu1  ;;  %1458 = vmatpush3.bf16.msra.mxu0 %v1455_v60  ;;  %v1031_v42 = vadd.s32 %v1030_v40, %v1028_v39 }
 0x2d4   : > { %v1459_v5 = vpack.c.bf16 %v905_v62, %v904_v0  ;;  %v860_v6 = vadd.f32 %v859_v4, %v667_v54  ;;  %v930_v44 = vpop.permute.xlu0 %929 }
 0x2d5   : > { %v907_v7 = vmax.f32 %v865_v3, 0.0  ;;  %vm1032_vm2 = vcmp.lt.s32.totalorder %v1031_v42, 300 }
 0x2d6   : > { %v906_v8 = vmax.f32 %v860_v6, 0.0  ;;  %v1386_v9 = vpop.f32.mrb[10].mxu1  ;;  %1460 = vmatprep.subr.bf16.mxu0 %v1459_v5 }
 0x2d7   : > { %v875_v10 = vadd.f32 %v1386_v9, %v682_v63  ;;  %v869_v11 = vpop.f32.mrb[11].mxu1  ;;  %1462 = vmatpush3.bf16.msra.mxu0 %v1459_v5 }
 0x2d8   : > { %v1463_v13 = vpack.c.bf16 %v907_v7, %v906_v8  ;;  %v870_v14 = vadd.f32 %v869_v11, %v677_v2 }
 0x2d9   : > { %v909_v16 = vmax.f32 %v875_v10, 0.0 }
 0x2da   : > { %v908_v17 = vmax.f32 %v870_v14, 0.0  ;;  %v1389_v18 = vpop.f32.mrb[12].mxu1  ;;  %1464 = vmatprep.subr.bf16.mxu0 %v1463_v13 }
 0x2db   : > { %v885_v19 = vadd.f32 %v1389_v18, %v692_v12  ;;  %v879_v20 = vpop.f32.mrb[13].mxu1  ;;  %1466 = vmatpush3.bf16.msra.mxu0 %v1463_v13 }
 0x2dc   : > { %v1467_v21 = vpack.c.bf16 %v909_v16, %v908_v17  ;;  %v880_v22 = vadd.f32 %v879_v20, %v687_v15 }
 0x2dd   : > { %v911_v23 = vmax.f32 %v885_v19, 0.0 }
 0x2de   : > { %v910_v25 = vmax.f32 %v880_v22, 0.0  ;;  %v1392_v26 = vpop.f32.mrb[14].mxu1  ;;  %1468 = vmatprep.subr.bf16.mxu0 %v1467_v21 }
 0x2df   : > { %v895_v28 = vadd.f32 %v1392_v26, %v702_v24  ;;  %v889_v29 = vpop.f32.mrb[15].mxu1  ;;  %1470 = vmatpush3.bf16.msra.mxu0 %v1467_v21 }
 0x2e0   : > { %v1471_v30 = vpack.c.bf16 %v911_v23, %v910_v25  ;;  %v890_v31 = vadd.f32 %v889_v29, %v697_v27 }
 0x2e1   : > { %v913_v32 = vmax.f32 %v895_v28, 0.0 }
 0x2e2   : > { %v912_v33 = vmax.f32 %v890_v31, 0.0  ;;  %1472 = vmatprep.subr.bf16.mxu0 %v1471_v30 }
 0x2e3   : > { %1474 = vmatpush3.bf16.msra.mxu0 %v1471_v30 }
 0x2e4   : > { %v1475_v34 = vpack.c.bf16 %v913_v32, %v912_v33 }
 0x2e6   : > { %1476 = vmatprep.subr.bf16.mxu0 %v1475_v34 }
 0x2e7   : > { %1478 = vmatpush3.bf16.msra.mxu0 %v1475_v34 }
 0x2ea   : > { %1426 = vmatmul.mubr.f32.vlgmr.msra.gmra.mrb[8].mxu0 %v915_v35 }
 0x2eb   : > { %1428 = vmatprep.mubr.f32.mxu0 %v916_v36 }
 0x2ee   : > { %1429 = vmatmul.mubr.f32.gmra.mrb[10].mxu0 %v917_v37 }
 0x3bd   : > { %v1427_v45 = vpop.f32.mrb[8].mxu0 }
 0x3be   : > { %v1014_v46 = vadd.f32 %v1427_v45, %v930_v44  ;;  %v1008_v47 = vpop.f32.mrb[9].mxu0 }
 0x3bf   : > { %v1009_v48 = vadd.f32 %v1008_v47, %v925_v43 }
 0x3c0   : > { %v1034_v49 = vsel %vm1032_vm2, %v1014_v46, -inf }
 0x3c1   : > { %1039 = vmax.xlane.f32.xlu1 %v1034_v49  ;;  %v1430_v50 = vpop.f32.mrb[10].mxu0  ;;  %v1033_v51 = vsel %vm1032_vm2, %v1009_v48, -inf }
 0x3c2   : > { %v1024_v53 = vadd.f32 %v1430_v50, %v940_v41  ;;  %v1018_v54 = vpop.f32.mrb[11].mxu0  ;;  %1037 = vmax.xlane.f32.xlu0 %v1033_v51 }
 0x3c3   : > { %v1019_v55 = vadd.f32 %v1018_v54, %v935_v52 }
 0x3c4   : > { %v1036_v57 = vsel %vm1032_vm2, %v1024_v53, -inf }
 0x3c5   : > { %v1035_v56 = vsel %vm1032_vm2, %v1019_v55, -inf  ;;  %v1044_v58 = vsel %vm1043_vm3, %v1036_v57, -inf }
 0x3c6   : > { %1041 = vmax.xlane.f32.xlu0 %v1035_v56 }
 0x3ca   : > { %1045 = vmax.xlane.f32.xlu0 %v1044_v58 }
 0x44e   : > { %v1040_v59 = vpop.xlane.xlu1 %1039 }
 0x44f   : > { %v1038_v60 = vpop.xlane.xlu0 %1037  ;;  %1053 = vst.msk [vmem:[%s2403_s27 + $0x8] sm:$0xff] (!%p1278_p0), %vm1051_vm4, %v1040_v59 }
 0x450   : > { %1052 = vst.msk [vmem:[%s2403_s27] sm:$0xff] (!%p1278_p0), %vm1051_vm4, %v1038_v60 }
 0x451   : > { %1050 = sbr.rel (%p1278_p0) target bundleno = 1113 (0x459), region = 80 }
 0x453   : > { %v1042_v61 = vpop.xlane.xlu0 %1041 }
 0x454   : > { %1054 = vst.msk [vmem:[%s2403_s27 + $0x10] sm:$0xff] (!%p1278_p0), %vm1051_vm4, %v1042_v61 }
 0x457   : > { %v1046_v62 = vpop.xlane.xlu0 %1045 }
 0x458   : > { %1056 = vst.msk [vmem:[%s2403_s27 + $0x18] sm:$0x1f] %vm1055_vm5, %v1046_v62 }
 0x459 PF: > { %s2539_s22 = sld [smem:[#allocation21_spill]] }
 0x45f   : > { %p1279_p3 = scmp.le.s32.totalorder %s2539_s22, 0 }
 0x460   : > { %v1061_v63 = vld [vmem:[%s2403_s27] sm:$0xff] (!%p1279_p3)  ;;  %vm1069_vm6 = vcmask (!%p1279_p3), 7168   ;;  %v1062_v0 = vld [vmem:[%s2403_s27 + $0x8] sm:$0xff] (!%p1279_p3)  ;;  %v1063_v1 = vld [vmem:[%s2403_s27 + $0x10] sm:$0xff] (!%p1279_p3)  ;;  %vm1073_vm7 = vcmask (!%p1279_p3), 4096  }
 0x461   : > { %1060 = sbr.rel (%p1279_p3) target bundleno = 1128 (0x468), region = 84  ;;  %v1065_v2 = vmax.f32 (!%p1279_p3), %v1061_v63, %v1038_v60  ;;  %v1066_v3 = vmax.f32 (!%p1279_p3), %v1062_v0, %v1040_v59  ;;  %v1067_v4 = vmax.f32 (!%p1279_p3), %v1063_v1, %v1042_v61  ;;  %v1064_v5 = vld [vmem:[%s2403_s27 + $0x18] sm:$0x1f] (!%p1279_p3) }
 0x462   : > { %v1068_v6 = vmax.f32 (!%p1279_p3), %v1064_v5, %v1046_v62 }
 0x463   : > { %1070 = vst.msk [vmem:[%s2403_s27] sm:$0xff] (!%p1279_p3), %vm1069_vm6, %v1065_v2  ;;  %1071 = vst.msk [vmem:[%s2403_s27 + $0x8] sm:$0xff] (!%p1279_p3), %vm1069_vm6, %v1066_v3 }
 0x464   : > { %1072 = vst.msk [vmem:[%s2403_s27 + $0x10] sm:$0xff] (!%p1279_p3), %vm1069_vm6, %v1067_v4 }
 0x465   : > { %1074 = vst.msk [vmem:[%s2403_s27 + $0x18] sm:$0x1f] (!%p1279_p3), %vm1073_vm7, %v1068_v6 }
 0x468 PF: > { %s2540_s23 = sld [smem:[#allocation22_spill]]  ;;  %s2541_s4 = sld [smem:[#allocation29_spill]] }
 0x469   : > { %s1089_s0 = sshll.u32 %s2403_s27, 4  ;;  %s2430_s1 = scalar_lea.sflag [#allocation4], %s394_s3  ;;  %s2426_s0 = int_to_ptr.vmem [resolvable:$true] %s1089_s0 }
 0x46a   : > { %s1848_s12 = scalar_lea.vmem %s2426_s0, 512  ;;  %p2542_p12 = scmp.ne.s32.totalorder %s2531_s20, 0 }
 0x46b   : > { %p1849_p5 = scmp.ne.s32.totalorder %s2426_s0, %s1848_s12  ;;  %s1994_s14 = smov [#allocation14]  }
 0x46c   : > { %s1852_s13 = sshll.u32 %s1994_s14, 4  ;;  %s1853_s13 = int_to_ptr.vmem [resolvable:$false] %s1852_s13 }
 0x46d   : > { %p1850_p10 = pnand %p1849_p5, %p2542_p12  ;;  %s1854_s15 = scalar_lea.vmem %s1853_s13, 1024 }
 0x46e   : > { %s1285_s8 = sshll.u32 %s2540_s23, 9  ;;  %p1855_p1 = scmp.lt.s32.totalorder %s2426_s0, %s1853_s13 }
 0x46f   : > { %s2423_s24 = scalar_lea.hbm %s2541_s4, %s1285_s8  ;;  %p1851_p7 = pneg %p1850_p10 }
 0x470   : > { %p1856_p11 = scmp.lt.s32.totalorder %s1854_s15, %s1848_s12 }
 0x472   : > { %p1857_p13 = por %p1856_p11, %p1855_p1 }
 0x474   : > { %p1858_p4 = pnand %p1857_p13, %p1851_p7 }
 0x476   : > { %1861 = shalt.err (!%p1858_p4)
}
 0x477   : > { %s1862_s3 = scalar_lea.hbm %s2423_s24, 512  ;;  %s1866_s23 = scalar_lea.hbm %s2541_s4, 1024 }
 0x478   : > { %p1863_p6 = scmp.ne.s32.totalorder %s2423_s24, %s1862_s3  ;;  %p1867_p9 = scmp.lt.u32.totalorder %s2423_s24, %s2541_s4 }
 0x479   : > { %p1868_p0 = scmp.lt.u32.totalorder %s1866_s23, %s1862_s3  ;;  %p1870_p5 = scmp.lt.u32.totalorder %s1862_s3, %s2423_s24 }
 0x47a   : > { %p1864_p8 = pnand %p1863_p6, %p2542_p12 }
 0x47b   : > { %p1869_p3 = por %p1868_p0, %p1867_p9 }
 0x47c   : > { %p1865_p2 = pneg %p1864_p8 }
 0x47d   : > { %p1871_p10 = por %p1870_p5, %p1869_p3 }
 0x47f   : > { %p1872_p7 = pnand %p1871_p10, %p1865_p2 }
 0x481   : > { %1875 = shalt.err (!%p1872_p7)
}
 0x482   : > { %s1995_s30 = smov 128   ;;  %s1996_s12 = smov 8  }
 0x483   : > { %1506 = dma.vmem_to_hbm [thread:$0]  (%p2542_p12), %s2426_s0, 512, %s2423_s24, %s2430_s1, %s1995_s30, %s1995_s30, %s1996_s12  }
 0x484 PF: > { %s2543_s14 = sld [smem:[#allocation20_spill]]  ;;  %p1548_p1 = scmp.ge.s32.totalorder %s1982_s11, 2 }
 0x485   : > { %p2544_p11 = scmp.ne.s32.totalorder %s2532_s19, 0 }
 0x487   : > { %p1532_p13 = pnand %p1548_p1, %p2544_p11 }
 0x48a   : > { %s1104_s13 = sand.u32 1, %s2543_s14  }
 0x48b   : > { %s1105_s15 = scalar_lea.sflag [#allocation4], %s1104_s13 }
 0x48c   : > { %1937 = dma.done.wait (!%p1532_p13), %s1105_s15, 512  }
 0x48d   : > { %1939 = vsyncadd (!%p1532_p13), %s1105_s15, 4294966784  ;;  %s26_s11 = sadd.s32 1, %s1982_s11   ;;  %s2545_s24 = smov %s1946_s25 }
 0x48e   : > { %p23_p4 = scmp.ge.s32.totalorder %s26_s11, 8   ;;  %s2546_s25 = smov %s1950_s26 }
 0x48f   : > { %s2547_s26 = smov %s2300_s7  ;;  %s2548_s27 = smov %s1958_s28 }
 0x490   : > { %s2549_s28 = smov %s1962_s29  ;;  %s2550_s29 = smov %s2303_s16 }
 0x491   : > { %s2551_s30 = smov %s1974_s9  ;;  %s2552_s8 = smov %s1978_s10 }
 0x492   : > { %s2553_s9 = smov %s2556_s17  ;;  %s2554_s10 = smov %s2560_s21 }
 0x493   :  { %25 = sbr.rel (!%p23_p4) target bundleno = 19 (0x13), region = 125 }
 0x49a   :  { %1110 = vsyncpa [#allocation3], 1 }
 0x49b   :  { %1112 = vsyncpa [#allocation3 + $0x1], 1 }
 0x49c   :  { %1113 = vsyncpa [#allocation6], 1 }
 0x49d   :  { %1114 = vsyncpa [#allocation9], 1 }
 0x49e   :  { %1115 = vsyncpa [#allocation12], 1 }
 0x49f   :  { %1116 = vsyncpa [#allocation4], 1 }
 0x4a0   :  { %1118 = vsyncpa [#allocation4 + $0x1], 1 }

</bundles_post_ra>
